<compile_context>
chip_gen: v7x
topology: tpu7x:2x2x1
jax: 0.10.0
libtpu: 0.0.40
codegen_flags: <defaults>
</compile_context>

<pallas_src>
import numpy as np
import jax
import jax.numpy as jnp
from jax.experimental import pallas as pl
from jax.experimental.pallas import tpu as pltpu


def _select_tiles():
    """(TP, TV) per MXU generation: 256-wide MXU on v6e/v7x, 128-wide before."""
    kind = ""
    try:
        kind = jax.devices()[0].device_kind.lower()
    except Exception:
        pass
    if "v6" in kind or "v7" in kind:
        return 1024, 256
    return 512, 128


def _scatter_mean_kernel(lo_ref, hi_ref, feats_ref, idx_ref, out_ref):
    vt = pl.program_id(0)            # voxel-slab index ("parallel")
    pt = pl.program_id(1)            # point-tile index ("arbitrary" reduction)
    tv = out_ref.shape[1]
    cnt_row = out_ref.shape[0] - 1   # last row of the resident block holds point counts
    base = vt * tv

    @pl.when(pt == 0)
    def _init():
        out_ref[...] = jnp.zeros_like(out_ref)

    # Points are sorted by voxel id, so only tiles in [lo, hi] can carry this slab's
    # points.  Outside that range the index_map clamps (DMA elided) and compute skipped.
    in_range = jnp.logical_and(pt >= lo_ref[vt], pt <= hi_ref[vt])

    @pl.when(in_range)
    def _accumulate():
        feats = feats_ref[...]                                   # (C+1, TP) f32, pts on lanes
        idx = idx_ref[...]                                       # (1, TP)  i32, -1 = drop/pad
        row = jax.lax.broadcasted_iota(jnp.int32, (tv, 1), 0)    # voxel slot within slab
        onehot_t = (row == (idx - base)).astype(jnp.float32)     # (TV, TP)
        # (C+1, TV) += feats @ onehot_t.T  — one MXU pass gives sums AND counts
        # (counts come from the fused ones-row of feats).
        out_ref[...] += jax.lax.dot_general(
            feats, onehot_t, (((1,), (1,)), ((), ())),
            preferred_element_type=jnp.float32)

    @pl.when(pt == pl.num_programs(1) - 1)
    def _finalize():
        acc = out_ref[...]
        cnt = acc[cnt_row:cnt_row + 1, :]                        # (1, TV) point counts
        # Exact divide (runs once per slab); approx reciprocal would break the 1e-5 tol.
        out_ref[...] = acc / jnp.maximum(cnt, 1.0)


def scatter_mean(feats_t, idx_row, lo, hi, m_pad, tp, tv):
    """Fused segment sum+count+mean: feats_t (C+1, N_pad) f32, idx_row (1, N_pad) i32
    -> (C+1, m_pad) f32 where rows 0..C-1 are per-voxel means (row C is scratch)."""
    cdim1, n_pad = feats_t.shape
    n_pt = n_pad // tp
    n_vt = m_pad // tv

    def _pt_index(v, p, lo_ref, hi_ref):
        # Clamp the point-tile block index into the slab's intersecting range so
        # non-intersecting steps reuse the previous block (Pallas elides the DMA).
        return (0, jnp.minimum(jnp.maximum(p, lo_ref[v]), hi_ref[v]))

    return pl.pallas_call(
        _scatter_mean_kernel,
        out_shape=jax.ShapeDtypeStruct((cdim1, m_pad), jnp.float32),
        grid_spec=pltpu.PrefetchScalarGridSpec(
            num_scalar_prefetch=2,                    # lo, hi -> SMEM
            grid=(n_vt, n_pt),
            in_specs=[
                pl.BlockSpec((cdim1, tp), _pt_index),
                pl.BlockSpec((1, tp), _pt_index),
            ],
            out_specs=pl.BlockSpec((cdim1, tv), lambda v, p, lo_ref, hi_ref: (0, v)),
        ),
        compiler_params=pltpu.CompilerParams(
            dimension_semantics=("parallel", "arbitrary")),
    )(lo, hi, feats_t, idx_row)


def dynamic_simple_vfe(features, coors, grid_dims, max_voxels, tiles=None):
    """JAX/Pallas port of DynamicSimpleVFE.forward (DynamicScatter with mean=True).

    Args:
      features: (N, C) float32 point features.
      coors:    (N, 4) int32 voxel coords (batch, z, y, x); any negative coord drops the point.
      grid_dims: (B, Dz, Dy, Dx) static voxel-grid extents.
      max_voxels: static upper bound on #distinct voxels.

    Returns:
      voxel_feats (max_voxels, C), voxel_coors (max_voxels, 4), num_voxels.
      Rows >= num_voxels are padding (coords set to -1).
    """
    n, c = features.shape
    b_max, dz, dy, dx = grid_dims
    sentinel = b_max * dz * dy * dx           # one past the last valid linear id
    tp, tv = tiles if tiles is not None else _select_tiles()

    valid = jnp.all(coors >= 0, axis=1)
    lin = ((coors[:, 0] * dz + coors[:, 1]) * dy + coors[:, 2]) * dx + coors[:, 3]
    lin = jnp.where(valid, lin, sentinel).astype(jnp.int32)

    # Single sort by voxel id (mean is order-independent).  Segment ids come straight
    # from the sorted stream via a change-flag cumsum (no second sort a la jnp.unique).
    order = jnp.argsort(lin)
    lin_s = lin[order]
    feats_s = features[order].astype(jnp.float32)

    is_new = jnp.concatenate([jnp.ones((1,), jnp.bool_), lin_s[1:] != lin_s[:-1]])
    seg = jnp.cumsum(is_new.astype(jnp.int32)) - 1            # (N,), 0-based segment id

    # Representative linear id per voxel slot (slot max_voxels is an overflow dump).
    uids = jnp.full((max_voxels + 1,), sentinel, jnp.int32)
    uids = uids.at[jnp.minimum(seg, max_voxels)].set(lin_s)[:max_voxels]

    # Point -> voxel-slot index; dropped points and slots beyond max_voxels map to -1 so
    # they hit no one-hot column (no aliasing into kept voxels).
    # TODO(synk): exceeding max_voxels still silently drops voxels (same bound as the
    # original size-bounded unique); add a host-side check on num_voxels if that can happen.
    inv = jnp.where((lin_s < sentinel) & (seg < max_voxels), seg, -1).astype(jnp.int32)

    # Pad points to a multiple of TP, voxel slots to a multiple of TV.  Append the fused
    # count row (ones) so a single MXU pass yields both sums and counts.
    n_pad = int(np.ceil(n / tp) * tp)
    m_pad = int(np.ceil(max_voxels / tv) * tv)
    pad = n_pad - n
    feats_aug = jnp.concatenate([feats_s, jnp.ones((n, 1), jnp.float32)], axis=1)
    feats_t = jnp.pad(feats_aug, ((0, pad), (0, 0))).T              # (C+1, N_pad)
    idx_row = jnp.pad(inv, (0, pad), constant_values=-1)[None, :]   # (1, N_pad) lane-dense

    # Per point-tile voxel-id range -> per voxel-slab [lo, hi] intersecting-tile range
    # (scalar-prefetched; drives both the DMA elision and the in-kernel skip).
    n_pt = n_pad // tp
    n_vt = m_pad // tv
    tiles_2d = idx_row[0].reshape(n_pt, tp)
    big = jnp.int32(jnp.iinfo(jnp.int32).max)
    tmin = jnp.min(jnp.where(tiles_2d >= 0, tiles_2d, big), axis=1)
    tmax = jnp.max(jnp.where(tiles_2d >= 0, tiles_2d, -1), axis=1)
    tmax_m = jnp.where(tmax < 0, big, tmax)            # all-padding tiles sort last
    bases = jnp.arange(n_vt, dtype=jnp.int32) * tv
    lo = jnp.searchsorted(tmax_m, bases, side='left').astype(jnp.int32)
    hi = (jnp.searchsorted(tmin, bases + tv, side='left') - 1).astype(jnp.int32)
    empty = hi < lo                                    # slab with no points: harmless
    lo = jnp.where(empty, 0, lo)                       # single zero-contribution tile
    hi = jnp.where(empty, 0, hi)

    out_t = scatter_mean(feats_t, idx_row, lo, hi, m_pad, tp, tv)   # (C+1, m_pad)
    voxel_feats = out_t[:c, :max_voxels].T                          # (max_voxels, C)

    # Decode unique linear ids back to (batch, z, y, x) voxel coordinates.
    is_real = uids != sentinel
    uid = jnp.where(is_real, uids, 0)
    x = uid % dx
    y = (uid // dx) % dy
    z = (uid // (dx * dy)) % dz
    b = uid // (dx * dy * dz)
    voxel_coors = jnp.stack([b, z, y, x], axis=1).astype(jnp.int32)
    voxel_coors = jnp.where(is_real[:, None], voxel_coors, -1)
    num_voxels = jnp.sum(is_real.astype(jnp.int32))
    return voxel_feats, voxel_coors, num_voxels


if __name__ == "__main__":
    key = jax.random.PRNGKey(0)
    kf, kb, kz, ky, kx = jax.random.split(key, 5)

    N, C = 256, 4
    grid_dims = (2, 1, 8, 8)   # (batch, z, y, x) voxel-grid extents
    max_voxels = 128           # = 2*1*8*8, static upper bound on distinct voxels

    features = jax.random.normal(kf, (N, C), jnp.float32)
    coors = jnp.stack([
        jax.random.randint(kb, (N,), 0, grid_dims[0]),
        jax.random.randint(kz, (N,), 0, grid_dims[1]),
        jax.random.randint(ky, (N,), 0, grid_dims[2]),
        jax.random.randint(kx, (N,), 0, grid_dims[3]),
    ], axis=1).astype(jnp.int32)

    voxel_feats, voxel_coors, num_voxels = dynamic_simple_vfe(
        features, coors, grid_dims, max_voxels)
    jax.block_until_ready((voxel_feats, voxel_coors, num_voxels))

    # Plain-JAX reference (segment mean) for a sanity check.
    _, dz, dy, dx = grid_dims
    lin = ((coors[:, 0] * dz + coors[:, 1]) * dy + coors[:, 2]) * dx + coors[:, 3]
    uids_ref, inv_ref = jnp.unique(
        lin, size=max_voxels, fill_value=grid_dims[0] * dz * dy * dx, return_inverse=True)
    sums = jax.ops.segment_sum(features, inv_ref.reshape(-1), num_segments=max_voxels)
    cnts = jax.ops.segment_sum(jnp.ones((N,), jnp.float32), inv_ref.reshape(-1),
                               num_segments=max_voxels)
    ref = sums / jnp.maximum(cnts, 1.0)[:, None]
    np.testing.assert_allclose(np.asarray(voxel_feats), np.asarray(ref),
                               rtol=1e-5, atol=1e-5)

    print("KERNEL_OK")
</pallas_src>

<mosaic_0001>
module attributes {stable_mosaic.version = 11 : i64} {
  func.func @_scatter_mean_kernel(%arg0: i32, %arg1: i32, %arg2: memref<1xi32, #tpu.memory_space<smem>>, %arg3: memref<1xi32, #tpu.memory_space<smem>>, %arg4: memref<5x512xf32, #tpu.memory_space<vmem>>, %arg5: memref<1x512xi32, #tpu.memory_space<vmem>>, %arg6: memref<5x128xf32, #tpu.memory_space<vmem>>) attributes {dimension_semantics = [#tpu.dimension_semantics<parallel>, #tpu.dimension_semantics<arbitrary>], iteration_bounds = array<i64: 1, 1>, scalar_prefetch = 2 : i64, scratch_operands = 0 : i64, tpu.core_type = #tpu.core_type<tc>, window_params = [{transform_indices = @transform_0, window_bounds = array<i64: 5, 512>}, {transform_indices = @transform_1, window_bounds = array<i64: 1, 512>}, {transform_indices = @transform_2, window_bounds = array<i64: 5, 128>}]} {
    %c128_i32 = arith.constant 128 : i32
    %0 = arith.muli %arg0, %c128_i32 : i32
    %c0_i32 = arith.constant 0 : i32
    %1 = arith.cmpi eq, %arg1, %c0_i32 : i32
    %2 = arith.extui %1 : i1 to i32
    %c0_i32_0 = arith.constant 0 : i32
    %3 = arith.cmpi ne, %2, %c0_i32_0 : i32
    scf.if %3 {
      %cst = arith.constant 0.000000e+00 : f32
      %16 = vector.broadcast %cst : f32 to vector<5x128xf32>
      %c0 = arith.constant 0 : index
      %c0_4 = arith.constant 0 : index
      %17 = vector.load %arg6[%c0, %c0_4] : memref<5x128xf32, #tpu.memory_space<vmem>>, vector<5x128xf32>
      tpu.vector_store %arg6[%c0, %c0_4], %16 {strides = array<i32>} : memref<5x128xf32, #tpu.memory_space<vmem>>, vector<5x128xf32>,
    } else {
    }
    %4 = arith.index_cast %arg0 : i32 to index
    %5 = memref.load %arg2[%4] : memref<1xi32, #tpu.memory_space<smem>>
    %6 = arith.cmpi sge, %arg1, %5 : i32
    %7 = arith.index_cast %arg0 : i32 to index
    %8 = memref.load %arg3[%7] : memref<1xi32, #tpu.memory_space<smem>>
    %9 = arith.cmpi sle, %arg1, %8 : i32
    %10 = arith.andi %6, %9 : i1
    %11 = arith.extui %10 : i1 to i32
    %c0_i32_1 = arith.constant 0 : i32
    %12 = arith.cmpi ne, %11, %c0_i32_1 : i32
    scf.if %12 {
      %c0 = arith.constant 0 : index
      %c0_4 = arith.constant 0 : index
      %16 = vector.load %arg4[%c0, %c0_4] : memref<5x512xf32, #tpu.memory_space<vmem>>, vector<5x512xf32>
      %c0_5 = arith.constant 0 : index
      %c0_6 = arith.constant 0 : index
      %17 = vector.load %arg5[%c0_5, %c0_6] : memref<1x512xi32, #tpu.memory_space<vmem>>, vector<1x512xi32>
      %18 = tpu.iota {dimensions = array<i32: 0>} : vector<128x1xi32>
      %19 = vector.broadcast %0 : i32 to vector<1x512xi32>
      %20 = arith.subi %17, %19 : vector<1x512xi32>
      %21 = vector.broadcast %18 : vector<128x1xi32> to vector<128x512xi32>
      %22 = vector.broadcast %20 : vector<1x512xi32> to vector<128x512xi32>
      %23 = arith.cmpi eq, %21, %22 : vector<128x512xi32>
      %24 = arith.extui %23 : vector<128x512xi1> to vector<128x512xi32>
      %25 = arith.sitofp %24 : vector<128x512xi32> to vector<128x512xf32>
      %c0_7 = arith.constant 0 : index
      %c0_8 = arith.constant 0 : index
      %26 = vector.load %arg6[%c0_7, %c0_8] : memref<5x128xf32, #tpu.memory_space<vmem>>, vector<5x128xf32>
      %cst = arith.constant dense<0.000000e+00> : vector<5x128xf32>
      %27 = tpu.matmul %16, %25, %cst {dimension_numbers = #tpu.dot_dimension_numbers<[1], [1], [0], [0], [0, 0, 1, 0], [], []>} : vector<5x512xf32>, vector<128x512xf32>, vector<5x128xf32> -> vector<5x128xf32>
      %28 = arith.addf %26, %27 : vector<5x128xf32>
      %c0_9 = arith.constant 0 : index
      %c0_10 = arith.constant 0 : index
      %29 = vector.load %arg6[%c0_9, %c0_10] : memref<5x128xf32, #tpu.memory_space<vmem>>, vector<5x128xf32>
      tpu.vector_store %arg6[%c0_9, %c0_10], %28 {strides = array<i32>} : memref<5x128xf32, #tpu.memory_space<vmem>>, vector<5x128xf32>,
    } else {
    }
    %c0_i32_2 = arith.constant 0 : i32
    %13 = arith.cmpi eq, %arg1, %c0_i32_2 : i32
    %14 = arith.extui %13 : i1 to i32
    %c0_i32_3 = arith.constant 0 : i32
    %15 = arith.cmpi ne, %14, %c0_i32_3 : i32
    scf.if %15 {
      %c0 = arith.constant 0 : index
      %c0_4 = arith.constant 0 : index
      %16 = vector.load %arg6[%c0, %c0_4] : memref<5x128xf32, #tpu.memory_space<vmem>>, vector<5x128xf32>
      %17 = vector.extract_strided_slice %16 {offsets = [4, 0], sizes = [1, 128], strides = [1, 1]} : vector<5x128xf32> to vector<1x128xf32>
      %cst = arith.constant 1.000000e+00 : f32
      %18 = vector.broadcast %cst : f32 to vector<1x128xf32>
      %19 = arith.maximumf %17, %18 : vector<1x128xf32>
      %20 = vector.broadcast %19 : vector<1x128xf32> to vector<5x128xf32>
      %21 = arith.divf %16, %20 : vector<5x128xf32>
      %c0_5 = arith.constant 0 : index
      %c0_6 = arith.constant 0 : index
      %22 = vector.load %arg6[%c0_5, %c0_6] : memref<5x128xf32, #tpu.memory_space<vmem>>, vector<5x128xf32>
      tpu.vector_store %arg6[%c0_5, %c0_6], %21 {strides = array<i32>} : memref<5x128xf32, #tpu.memory_space<vmem>>, vector<5x128xf32>,
    } else {
    }
    return
  }
  func.func @transform_0(%arg0: i32, %arg1: i32, %arg2: memref<1xi32, #tpu.memory_space<smem>>, %arg3: memref<1xi32, #tpu.memory_space<smem>>) -> (i32, i32) {
    %0 = arith.index_cast %arg0 : i32 to index
    %1 = memref.load %arg2[%0] : memref<1xi32, #tpu.memory_space<smem>>
    %2 = arith.maxsi %arg1, %1 : i32
    %3 = arith.index_cast %arg0 : i32 to index
    %4 = memref.load %arg3[%3] : memref<1xi32, #tpu.memory_space<smem>>
    %5 = arith.minsi %2, %4 : i32
    %c0_i32 = arith.constant 0 : i32
    %c0_i32_0 = arith.constant 0 : i32
    return %c0_i32, %5 : i32, i32
  }
  func.func @transform_1(%arg0: i32, %arg1: i32, %arg2: memref<1xi32, #tpu.memory_space<smem>>, %arg3: memref<1xi32, #tpu.memory_space<smem>>) -> (i32, i32) {
    %0 = arith.index_cast %arg0 : i32 to index
    %1 = memref.load %arg2[%0] : memref<1xi32, #tpu.memory_space<smem>>
    %2 = arith.maxsi %arg1, %1 : i32
    %3 = arith.index_cast %arg0 : i32 to index
    %4 = memref.load %arg3[%3] : memref<1xi32, #tpu.memory_space<smem>>
    %5 = arith.minsi %2, %4 : i32
    %c0_i32 = arith.constant 0 : i32
    %c0_i32_0 = arith.constant 0 : i32
    return %c0_i32, %5 : i32, i32
  }
  func.func @transform_2(%arg0: i32, %arg1: i32, %arg2: memref<1xi32, #tpu.memory_space<smem>>, %arg3: memref<1xi32, #tpu.memory_space<smem>>) -> (i32, i32) {
    %c0_i32 = arith.constant 0 : i32
    %c0_i32_0 = arith.constant 0 : i32
    return %c0_i32, %arg0 : i32, i32
  }
}

</mosaic_0001>

<bundles_post_ra>
// kernel: tpu_custom_call.1
= control target key start
LH: loop header
LB: loop body
LE: loop exit
PB: predicated region body
PF: predicated region fallthrough
CT: control target
= control target key end

     0   :  { %11 = vsyncpa [#allocation6], 0  ;;  %s969_s0 = inlined_call_operand.<no memory space> [shape: s32[1], index: 0, kind: input, shape index: {}]   ;;  %s970_s1 = inlined_call_operand.<no memory space> [shape: s32[1], index: 1, kind: input, shape index: {}]   ;;  %s971_s2 = inlined_call_operand.hbm [shape: f32[5,512], index: 2, kind: input, shape index: {}]   ;;  %s972_s3 = inlined_call_operand.vmem [shape: s32[1,512], index: 3, kind: input, shape index: {}]   ;;  %s973_s4 = inlined_call_operand.hbm [shape: f32[5,128], index: 4, kind: output, shape index: {}]  }
   0x1   :  { %12 = vsyncpa [#allocation7], 0  ;;  %p509_p0 = scmp.lt.s32.totalorder %s969_s0, 0  ;;  %s765_s22 = smov [#allocation5]  }
   0x2   :  { %s28_s23 = sshll.u32 %s765_s22, 4  ;;  %s717_s7 = scalar_lea.hbm %s971_s2, 512  ;;  %s29_s23 = int_to_ptr.vmem [resolvable:$true] %s28_s23 }
   0x3   :  { %s17_s19 = scalar_select %p509_p0, 0, %s969_s0 }
   0x5   :  { %p19_p1 = scmp.lt.s32.totalorder %s17_s19, %s970_s1 }
   0x7   :  { %s975_s19 = smov (!%p19_p1, %s17_s19), %s970_s1 }
   0x8   :  { %s644_s26 = sshll.u32 %s975_s19, 9 }
   0x9   :  { %s26_s29 = scalar_lea.hbm %s971_s2, %s644_s26 }
   0xa   :  { %s715_s30 = scalar_lea.hbm %s26_s29, 512  ;;  %p718_p3 = scmp.lt.u32.totalorder %s26_s29, %s971_s2 }
   0xb   :  { %p716_p2 = scmp.ne.s32.totalorder %s26_s29, %s715_s30  ;;  %p719_p4 = scmp.lt.u32.totalorder %s717_s7, %s715_s30 }
   0xc   :  { %p721_p6 = scmp.lt.u32.totalorder %s715_s30, %s26_s29 }
   0xd   :  { %p720_p5 = por %p719_p4, %p718_p3 }
   0xf   :  { %p722_p7 = por %p721_p6, %p720_p5 }
  0x11   :  { %p723_p8 = pnand %p722_p7, %p716_p2 }
  0x13   :  { %726 = shalt.err (!%p723_p8)
}
  0x14   :  { %s727_s10 = scalar_lea.vmem %s29_s23, 512  ;;  %p732_p10 = scmp.lt.s32.totalorder %s29_s23, %s29_s23 }
  0x15   :  { %p728_p9 = scmp.ne.s32.totalorder %s29_s23, %s727_s10  ;;  %p733_p11 = scmp.lt.s32.totalorder %s727_s10, %s727_s10 }
  0x17   :  { %p734_p12 = por %p733_p11, %p732_p10 }
  0x19   :  { %p735_p13 = pnand %p734_p12, %p728_p9 }
  0x1b   :  { %738 = shalt.err (!%p735_p13)
}
  0x1c   :  { %31 = dma.hbm_to_vmem [thread:$0]  %s26_s29, 512, %s29_s23, [#allocation6]  }
  0x1d   :  { %761 = dma.done.wait [#allocation6], 512  }
  0x1e   :  { %762 = vsyncadd [#allocation6], 4294966784  ;;  %s513_s11 = sshll.u32 %s975_s19, 2  ;;  %p514_p0 = scmp.le.s32.totalorder %s969_s0, 0  ;;  %v766_v0 = vmov 0.0  }
  0x1f   :  { %p78_p1 = scmp.lt.s32.totalorder %s513_s11, 3  ;;  %93 = vst [vmem:[#allocation8] sm:$0x1f] %v766_v0  ;;  %p515_p2 = scmp.ge.s32.totalorder %s970_s1, 0 }
  0x21   :  { %s977_s11 = smov (!%p78_p1, %s513_s11), 3  ;;  %p98_p3 = pnand %p515_p2, %p514_p0 }
  0x22   :  { %s80_s17 = scalar_lea.vmem %s972_s3, %s977_s11  ;;  %v107_v1 = vlaneseq (!%p98_p3)  ;;  %v103_v2 = vld [vmem:[#allocation5 + $0x8] sm:$0x1f] (!%p98_p3)  ;;  %v105_v3 = vld [vmem:[#allocation5 + $0x18] sm:$0x1f] (!%p98_p3)  ;;  %v767_v17 = vmov (!%p98_p3), 1.0|1.0  }
  0x23   :  { %101 = sbr.rel (%p98_p3) target bundleno = 327 (0x147), region = 21  ;;  %399 = vmatprep.mubr.f32.mxu0 (!%p98_p3), %v103_v2  ;;  %469 = vmatprep.mubr.f32.mxu1 (!%p98_p3), %v105_v3  ;;  %v106_v5 = vld [vmem:[%s80_s17] sm:$0xf] (!%p98_p3)  ;;  %v104_v31 = vld [vmem:[#allocation5 + $0x10] sm:$0x1f] (!%p98_p3) }
  0x24   :  { %v828_v4 = vshrl.u32 (!%p98_p3), %v107_v1, 7  ;;  %v102_v30 = vld [vmem:[#allocation5] sm:$0x1f] (!%p98_p3) }
  0x26   :  { %v109_v6 = vadd.s32 (!%p98_p3), 8, %v828_v4  ;;  %v132_v7 = vsub.s32 (!%p98_p3), 1, %v828_v4  ;;  %v140_v8 = vsub.s32 (!%p98_p3), 3, %v828_v4  ;;  %v128_v9 = vsub.s32 (!%p98_p3), 0, %v828_v4  ;;  %v334_v33 = vld [vmem:[#allocation8] sm:$0x1f] (!%p98_p3) }
  0x27   :  { %v136_v10 = vsub.s32 (!%p98_p3), 2, %v828_v4  ;;  %v110_v11 = vadd.s32 (!%p98_p3), 16, %v828_v4  ;;  %v111_v15 = vadd.s32 (!%p98_p3), 24, %v828_v4  ;;  %v112_v18 = vadd.s32 (!%p98_p3), 32, %v828_v4 }
  0x28   :  { %v836_v12 = vrot.slane (!%p98_p3), %v106_v5, %v132_v7  ;;  %v838_v13 = vrot.slane (!%p98_p3), %v106_v5, %v140_v8  ;;  %v840_v14 = vrot.slane (!%p98_p3), %v106_v5, %v128_v9  ;;  %v113_v19 = vadd.s32 (!%p98_p3), 40, %v828_v4 }
  0x29   :  { %v843_v16 = vrot.slane (!%p98_p3), %v106_v5, %v136_v10  ;;  %v114_v20 = vadd.s32 (!%p98_p3), 48, %v828_v4  ;;  %v115_v21 = vadd.s32 (!%p98_p3), 56, %v828_v4  ;;  %v116_v22 = vadd.s32 (!%p98_p3), 64, %v828_v4 }
  0x2a   :  { %vm143_vm0 = vcmp.eq.s32.totalorder %v828_v4, %v836_v12  ;;  %vm147_vm1 = vcmp.eq.s32.totalorder %v109_v6, %v836_v12  ;;  %vm145_vm2 = vcmp.eq.s32.totalorder %v828_v4, %v838_v13  ;;  %vm149_vm3 = vcmp.eq.s32.totalorder %v109_v6, %v838_v13 }
  0x2b   :  { %vm645_vm4 = vmpackc.low %vm147_vm1, %vm143_vm0  ;;  %vm142_vm5 = vcmp.eq.s32.totalorder %v828_v4, %v840_v14  ;;  %vm146_vm6 = vcmp.eq.s32.totalorder %v109_v6, %v840_v14  ;;  %vm144_vm7 = vcmp.eq.s32.totalorder %v828_v4, %v843_v16  ;;  %vm148_vm8 = vcmp.eq.s32.totalorder %v109_v6, %v843_v16 }
  0x2c   :  { %646 = vmatprep.subr.msk.bf16.mxu0 %vm645_vm4, %v767_v17  ;;  %vm677_vm9 = vmpackc.low %vm149_vm3, %vm145_vm2  ;;  %vm151_vm10 = vcmp.eq.s32.totalorder %v110_v11, %v836_v12  ;;  %vm155_vm11 = vcmp.eq.s32.totalorder %v111_v15, %v836_v12  ;;  %vm153_vm13 = vcmp.eq.s32.totalorder %v110_v11, %v838_v13  ;;  %vm157_vm14 = vcmp.eq.s32.totalorder %v111_v15, %v838_v13 }
  0x2d   :  { %678 = vmatprep.subr.msk.bf16.mxu1 %vm677_vm9, %v767_v17  ;;  %vm647_vm12 = vmpackc.low %vm146_vm6, %vm142_vm5  ;;  %vm150_vm1 = vcmp.eq.s32.totalorder %v110_v11, %v840_v14  ;;  %vm154_vm2 = vcmp.eq.s32.totalorder %v111_v15, %v840_v14  ;;  %vm152_vm4 = vcmp.eq.s32.totalorder %v110_v11, %v843_v16  ;;  %vm156_vm5 = vcmp.eq.s32.totalorder %v111_v15, %v843_v16 }
  0x2e   :  { %648 = vmatpush1.bf16.xpose.msk.msra.mxu0 %vm647_vm12, %v767_v17  ;;  %vm679_vm15 = vmpackc.low %vm148_vm8, %vm144_vm7  ;;  %vm159_vm6 = vcmp.eq.s32.totalorder %v112_v18, %v836_v12  ;;  %vm163_vm7 = vcmp.eq.s32.totalorder %v113_v19, %v836_v12  ;;  %vm161_vm9 = vcmp.eq.s32.totalorder %v112_v18, %v838_v13  ;;  %v117_v23 = vadd.s32 72, %v828_v4 }
  0x2f   :  { %680 = vmatpush1.bf16.xpose.msk.msra.mxu1 %vm679_vm15, %v767_v17  ;;  %vm649_vm0 = vmpackc.low %vm155_vm11, %vm151_vm10  ;;  %vm165_vm10 = vcmp.eq.s32.totalorder %v113_v19, %v838_v13  ;;  %v118_v24 = vadd.s32 80, %v828_v4  ;;  %v119_v25 = vadd.s32 88, %v828_v4  ;;  %v120_v26 = vadd.s32 96, %v828_v4 }
  0x30   :  { %650 = vmatprep.subr.msk.bf16.mxu0 %vm649_vm0, %v767_v17  ;;  %vm681_vm3 = vmpackc.low %vm157_vm14, %vm153_vm13  ;;  %vm158_vm13 = vcmp.eq.s32.totalorder %v112_v18, %v840_v14  ;;  %vm162_vm14 = vcmp.eq.s32.totalorder %v113_v19, %v840_v14  ;;  %vm160_vm0 = vcmp.eq.s32.totalorder %v112_v18, %v843_v16  ;;  %v121_v27 = vadd.s32 104, %v828_v4 }
  0x31   :  { %682 = vmatprep.subr.msk.bf16.mxu1 %vm681_vm3, %v767_v17  ;;  %vm651_vm8 = vmpackc.low %vm154_vm2, %vm150_vm1  ;;  %vm164_vm1 = vcmp.eq.s32.totalorder %v113_v19, %v843_v16  ;;  %vm167_vm2 = vcmp.eq.s32.totalorder %v114_v20, %v836_v12  ;;  %vm171_vm3 = vcmp.eq.s32.totalorder %v115_v21, %v836_v12  ;;  %v122_v28 = vadd.s32 112, %v828_v4 }
  0x32   :  { %vm683_vm11 = vmpackc.low %vm156_vm5, %vm152_vm4  ;;  %vm169_vm5 = vcmp.eq.s32.totalorder %v114_v20, %v838_v13  ;;  %v123_v29 = vadd.s32 120, %v828_v4 }
  0x33   :  { %vm653_vm12 = vmpackc.low %vm163_vm7, %vm159_vm6  ;;  %vm173_vm6 = vcmp.eq.s32.totalorder %v115_v21, %v838_v13 }
  0x34   :  { %vm685_vm15 = vmpackc.low %vm165_vm10, %vm161_vm9  ;;  %vm166_vm10 = vcmp.eq.s32.totalorder %v114_v20, %v840_v14 }
  0x35   :  { %vm655_vm4 = vmpackc.low %vm162_vm14, %vm158_vm13  ;;  %vm175_vm13 = vcmp.eq.s32.totalorder %v116_v22, %v836_v12  ;;  %vm179_vm14 = vcmp.eq.s32.totalorder %v117_v23, %v836_v12 }
  0x36   :  { %652 = vmatpush1.bf16.xpose.msk.msra.mxu0 %vm651_vm8, %v767_v17  ;;  %vm687_vm7 = vmpackc.low %vm164_vm1, %vm160_vm0  ;;  %vm177_vm1 = vcmp.eq.s32.totalorder %v116_v22, %v838_v13 }
  0x37   :  { %684 = vmatpush1.bf16.xpose.msk.msra.mxu1 %vm683_vm11, %v767_v17  ;;  %654 = vmatprep.subr.msk.bf16.mxu0 %vm653_vm12, %v767_v17  ;;  %vm657_vm8 = vmpackc.low %vm171_vm3, %vm167_vm2  ;;  %vm170_vm11 = vcmp.eq.s32.totalorder %v115_v21, %v840_v14  ;;  %vm168_vm12 = vcmp.eq.s32.totalorder %v114_v20, %v843_v16  ;;  %vm181_vm2 = vcmp.eq.s32.totalorder %v117_v23, %v838_v13 }
  0x38   :  { %686 = vmatprep.subr.msk.bf16.mxu1 %vm685_vm15, %v767_v17  ;;  %vm689_vm9 = vmpackc.low %vm173_vm6, %vm169_vm5  ;;  %vm172_vm15 = vcmp.eq.s32.totalorder %v115_v21, %v843_v16  ;;  %vm174_vm6 = vcmp.eq.s32.totalorder %v116_v22, %v840_v14 }
  0x39   :  { %vm659_vm0 = vmpackc.low %vm170_vm11, %vm166_vm10  ;;  %vm183_vm10 = vcmp.eq.s32.totalorder %v118_v24, %v836_v12  ;;  %vm187_vm11 = vcmp.eq.s32.totalorder %v119_v25, %v836_v12 }
  0x3a   :  { %vm691_vm3 = vmpackc.low %vm172_vm15, %vm168_vm12  ;;  %vm185_vm15 = vcmp.eq.s32.totalorder %v118_v24, %v838_v13 }
  0x3b   :  { %vm693_vm5 = vmpackc.low %vm181_vm2, %vm177_vm1  ;;  %vm182_vm2 = vcmp.eq.s32.totalorder %v118_v24, %v840_v14 }
  0x3e   :  { %656 = vmatpush1.bf16.xpose.msk.msra.mxu0 %vm655_vm4, %v767_v17  ;;  %vm661_vm4 = vmpackc.low %vm179_vm14, %vm175_vm13  ;;  %vm189_vm13 = vcmp.eq.s32.totalorder %v119_v25, %v838_v13 }
  0x3f   :  { %688 = vmatpush1.bf16.xpose.msk.msra.mxu1 %vm687_vm7, %v767_v17  ;;  %658 = vmatprep.subr.msk.bf16.mxu0 %vm657_vm8, %v767_v17  ;;  %vm178_vm7 = vcmp.eq.s32.totalorder %v117_v23, %v840_v14  ;;  %vm176_vm8 = vcmp.eq.s32.totalorder %v116_v22, %v843_v16  ;;  %vm697_vm1 = vmpackc.low %vm189_vm13, %vm185_vm15  ;;  %vm190_vm13 = vcmp.eq.s32.totalorder %v120_v26, %v840_v14 }
  0x40   :  { %690 = vmatprep.subr.msk.bf16.mxu1 %vm689_vm9, %v767_v17  ;;  %vm180_vm9 = vcmp.eq.s32.totalorder %v117_v23, %v843_v16  ;;  %vm663_vm12 = vmpackc.low %vm178_vm7, %vm174_vm6  ;;  %vm191_vm6 = vcmp.eq.s32.totalorder %v120_v26, %v836_v12  ;;  %vm195_vm7 = vcmp.eq.s32.totalorder %v121_v27, %v836_v12 }
  0x41   :  { %vm695_vm14 = vmpackc.low %vm180_vm9, %vm176_vm8  ;;  %vm193_vm9 = vcmp.eq.s32.totalorder %v120_v26, %v838_v13 }
  0x46   :  { %660 = vmatpush1.bf16.xpose.msk.msra.mxu0 %vm659_vm0, %v767_v17  ;;  %vm665_vm0 = vmpackc.low %vm187_vm11, %vm183_vm10  ;;  %vm197_vm10 = vcmp.eq.s32.totalorder %v121_v27, %v838_v13 }
  0x47   :  { %692 = vmatpush1.bf16.xpose.msk.msra.mxu1 %vm691_vm3, %v767_v17  ;;  %662 = vmatprep.subr.msk.bf16.mxu0 %vm661_vm4, %v767_v17  ;;  %vm186_vm3 = vcmp.eq.s32.totalorder %v119_v25, %v840_v14  ;;  %vm184_vm4 = vcmp.eq.s32.totalorder %v118_v24, %v843_v16  ;;  %vm701_vm15 = vmpackc.low %vm197_vm10, %vm193_vm9  ;;  %vm198_vm10 = vcmp.eq.s32.totalorder %v122_v28, %v840_v14 }
  0x48   :  { %694 = vmatprep.subr.msk.bf16.mxu1 %vm693_vm5, %v767_v17  ;;  %vm188_vm5 = vcmp.eq.s32.totalorder %v119_v25, %v843_v16  ;;  %vm667_vm8 = vmpackc.low %vm186_vm3, %vm182_vm2  ;;  %vm199_vm2 = vcmp.eq.s32.totalorder %v122_v28, %v836_v12  ;;  %vm203_vm3 = vcmp.eq.s32.totalorder %v123_v29, %v836_v12 }
  0x49   :  { %vm699_vm11 = vmpackc.low %vm188_vm5, %vm184_vm4  ;;  %vm201_vm5 = vcmp.eq.s32.totalorder %v122_v28, %v838_v13 }
  0x4e   :  { %664 = vmatpush1.bf16.xpose.msk.msra.mxu0 %vm663_vm12, %v767_v17  ;;  %vm669_vm12 = vmpackc.low %vm195_vm7, %vm191_vm6  ;;  %vm205_vm6 = vcmp.eq.s32.totalorder %v123_v29, %v838_v13 }
  0x4f   :  { %696 = vmatpush1.bf16.xpose.msk.msra.mxu1 %vm695_vm14, %v767_v17  ;;  %666 = vmatprep.subr.msk.bf16.mxu0 %vm665_vm0, %v767_v17  ;;  %vm194_vm14 = vcmp.eq.s32.totalorder %v121_v27, %v840_v14  ;;  %vm192_vm0 = vcmp.eq.s32.totalorder %v120_v26, %v843_v16  ;;  %vm705_vm9 = vmpackc.low %vm205_vm6, %vm201_vm5 }
  0x50   :  { %698 = vmatprep.subr.msk.bf16.mxu1 %vm697_vm1, %v767_v17  ;;  %vm196_vm1 = vcmp.eq.s32.totalorder %v121_v27, %v843_v16  ;;  %vm671_vm4 = vmpackc.low %vm194_vm14, %vm190_vm13 }
  0x51   :  { %vm703_vm7 = vmpackc.low %vm196_vm1, %vm192_vm0 }
  0x56   :  { %668 = vmatpush1.bf16.xpose.msk.msra.mxu0 %vm667_vm8, %v767_v17  ;;  %vm673_vm8 = vmpackc.low %vm203_vm3, %vm199_vm2 }
  0x57   :  { %700 = vmatpush1.bf16.xpose.msk.msra.mxu1 %vm699_vm11, %v767_v17  ;;  %670 = vmatprep.subr.msk.bf16.mxu0 %vm669_vm12, %v767_v17  ;;  %vm202_vm11 = vcmp.eq.s32.totalorder %v123_v29, %v840_v14  ;;  %vm200_vm12 = vcmp.eq.s32.totalorder %v122_v28, %v843_v16 }
  0x58   :  { %702 = vmatprep.subr.msk.bf16.mxu1 %vm701_vm15, %v767_v17  ;;  %vm204_vm15 = vcmp.eq.s32.totalorder %v123_v29, %v843_v16  ;;  %vm675_vm13 = vmpackc.low %vm202_vm11, %vm198_vm10 }
  0x59   :  { %vm707_vm14 = vmpackc.low %vm204_vm15, %vm200_vm12 }
  0x5e   :  { %672 = vmatpush1.bf16.xpose.msk.msra.mxu0 %vm671_vm4, %v767_v17 }
  0x5f   :  { %704 = vmatpush1.bf16.xpose.msk.msra.mxu1 %vm703_vm7, %v767_v17  ;;  %674 = vmatprep.subr.msk.bf16.mxu0 %vm673_vm8, %v767_v17 }
  0x60   :  { %706 = vmatprep.subr.msk.bf16.mxu1 %vm705_vm9, %v767_v17 }
  0x66   :  { %676 = vmatpush1.bf16.xpose.msk.msra.mxu0 %vm675_vm13, %v767_v17 }
  0x67   :  { %708 = vmatpush1.bf16.xpose.msk.msra.mxu1 %vm707_vm14, %v767_v17 }
  0x6d   :  { %400 = vmatmul.mubr.f32.vlgmr.msra.gmra.mrb[0].mxu0 %v102_v30 }
  0x6e   :  { %470 = vmatmul.mubr.f32.vlgmr.msra.gmra.mrb[0].mxu1 %v104_v31 }
 0x140   :  { %v401_v32 = vpop.f32.mrb[0].mxu0 }
 0x141   :  { %v471_v34 = vpop.f32.mrb[0].mxu1  ;;  %v403_v35 = vpop.f32.mrb[1].mxu0 }
 0x142   :  { %v472_v36 = vadd.f32 %v471_v34, %v401_v32  ;;  %v473_v37 = vpop.f32.mrb[1].mxu1 }
 0x144   :  { %v475_v38 = vadd.f32 %v472_v36, %v334_v33 }
 0x146   :  { %476 = vst [vmem:[#allocation8] sm:$0x1f] %v475_v38 }
 0x147 PF:  { %v482_v40 = vlaneseq  ;;  %s768_s0 = smov [#allocation8]  }
 0x148   :  { %s495_s1 = sshll.u32 %s768_s0, 4  ;;  %s496_s1 = int_to_ptr.vmem [resolvable:$true] %s495_s1 }
 0x149   :  { %v483_v42 = vshrl.u32 %v482_v40, 7  ;;  %s739_s3 = scalar_lea.vmem %s496_s1, 128  ;;  %p744_p5 = scmp.lt.s32.totalorder %s496_s1, %s496_s1 }
 0x14a   :  { %p740_p4 = scmp.ne.s32.totalorder %s496_s1, %s739_s3  ;;  %p745_p6 = scmp.lt.s32.totalorder %s739_s3, %s739_s3 }
 0x14b   :  { %v484_v43 = vsub.s32 4, %v483_v42 }
 0x14c   :  { %p746_p7 = por %p745_p6, %p744_p5 }
 0x14d   :  { %v480_v39 = vld [vmem:[#allocation8] sm:$0x1f] }
 0x14e   :  { %v481_v41 = vmax.f32 %v480_v39, 1.0  ;;  %p747_p8 = pnand %p746_p7, %p740_p4 }
 0x150   :  { %v485_v44 = vrot.slane %v481_v41, %v484_v43 }
 0x152   :  { %713 = vrcp.f32 %v485_v44 }
 0x15c   :  { %v714_v45 = vpop.eup %713 }
 0x15d   :  { %v487_v46 = vmul.f32 %v714_v45, %v480_v39 }
 0x15f   :  { %488 = vst [vmem:[#allocation8] sm:$0x1f] %v487_v46 }
 0x160   :  { %750 = shalt.err (!%p747_p8)
}
 0x161   :  { %s751_s20 = scalar_lea.hbm %s973_s4, 128 }
 0x162   :  { %p752_p9 = scmp.ne.s32.totalorder %s973_s4, %s751_s20  ;;  %p755_p10 = scmp.lt.u32.totalorder %s751_s20, %s973_s4 }
 0x164   :  { %p757_p11 = pnand %p755_p10, %p752_p9 }
 0x166   :  { %760 = shalt.err (!%p757_p11)
}
 0x167   :  { %498 = dma.vmem_to_hbm [thread:$0]  %s496_s1, 128, %s973_s4, [#allocation7]  }
 0x168   :  { %763 = dma.done.wait [#allocation7], 128  }
 0x169   :  { %764 = vsyncadd [#allocation7], 4294967168 }
 0x16a   :  { %502 = vsyncpa [#allocation6], 1 }
 0x16b   :  { %503 = vsyncpa [#allocation7], 1 }

</bundles_post_ra>
